<compile_context>
chip_gen: v7x
topology: tpu7x:2x2x1
jax: 0.10.0
libtpu: 0.0.40
codegen_flags: <defaults>
</compile_context>

<pallas_src>
import jax
import jax.numpy as jnp
from jax.experimental import pallas as pl
from jax.experimental.pallas import tpu as pltpu

IN_FEATURES = 10
OUT_FEATURES = 2
MAX_TM = 1024          # rows per batch tile (multiple of 8; mem-bound sweet spot)


def linear_kernel(x_ref, w_ref, b_ref, o_ref):
    # Hot path: MXU matmul + VPU bias add, all on the current (TM, IN) tile.
    x = x_ref[...]                      # (TM, IN)
    w = w_ref[...]                      # (IN, OUT) — resident across the grid
    b = b_ref[...]                      # (1, OUT)  — resident across the grid
    y = jnp.dot(x, w, preferred_element_type=jnp.float32) + b
    o_ref[...] = y.astype(o_ref.dtype)


def _round_up(n, m):
    return ((n + m - 1) // m) * m


def _pallas_linear(x, w_t, b2d):
    """x: (B, 10); w_t: (10, 2); b2d: (1, 2). Returns (B, 2)."""
    B = x.shape[0]

    # Tile size: cap at MAX_TM, but never larger than (padded) B; multiple of 8.
    tm = min(MAX_TM, _round_up(B, 8))
    Bp = _round_up(B, tm)
    if Bp != B:
        # Pad with zero rows; rows are independent, padded outputs are dropped.
        x = jnp.pad(x, ((0, Bp - B), (0, 0)))

    out = pl.pallas_call(
        linear_kernel,
        out_shape=jax.ShapeDtypeStruct((Bp, OUT_FEATURES), x.dtype),
        grid=(Bp // tm,),
        in_specs=[
            pl.BlockSpec((tm, IN_FEATURES), lambda i: (i, 0)),
            pl.BlockSpec((IN_FEATURES, OUT_FEATURES), lambda i: (0, 0)),
            pl.BlockSpec((1, OUT_FEATURES), lambda i: (0, 0)),
        ],
        out_specs=pl.BlockSpec((tm, OUT_FEATURES), lambda i: (i, 0)),
        compiler_params=pltpu.CompilerParams(
            dimension_semantics=("parallel",)),
    )(x, w_t, b2d)

    return out[:B] if Bp != B else out


def dummy_model_forward(x, weight, bias, *, min_pallas_batch=512):
    """x: (B, 10) f32; weight: (2, 10) f32 (PyTorch layout); bias: (2,) f32.

    For very small batches the launch + DMA setup cost of a pallas_call dwarfs
    the ~40 FLOPs of work, so fall back to plain XLA unless B is large enough.
    Pass min_pallas_batch=0 to force the kernel path.
    """
    B = x.shape[0]
    if B < min_pallas_batch:
        return x @ weight.T + bias

    w_t = weight.T                       # (10, 2) — glue reshape in plain JAX
    b2d = bias.reshape(1, OUT_FEATURES)  # keep 2-D for TPU-friendly layout
    # TODO(synk): optionally cast x/w to bf16 here (keep f32 accumulate) to
    # halve HBM read traffic on this mem-bound op, if accuracy permits.
    return _pallas_linear(x, w_t, b2d)


def init_params(key):
    # Deterministic init mirroring nn.Linear's default U(-1/sqrt(fan_in), 1/sqrt(fan_in)).
    kw, kb = jax.random.split(key)
    bound = 1.0 / jnp.sqrt(jnp.float32(IN_FEATURES))
    weight = jax.random.uniform(
        kw, (OUT_FEATURES, IN_FEATURES), jnp.float32, -bound, bound
    )
    bias = jax.random.uniform(kb, (OUT_FEATURES,), jnp.float32, -bound, bound)
    return weight, bias


if __name__ == "__main__":
    key = jax.random.PRNGKey(0)
    kx, kx2, kp = jax.random.split(key, 3)
    weight, bias = init_params(kp)

    # 1) Small-batch case matching the module spec (force the Pallas path so
    #    the kernel actually runs once).
    batch = 2
    x = jax.random.normal(kx, (batch, IN_FEATURES), dtype=jnp.float32)
    out = dummy_model_forward(x, weight, bias, min_pallas_batch=0)
    out = jax.block_until_ready(out)
    ref = x @ weight.T + bias
    assert out.shape == (batch, OUT_FEATURES)
    assert jnp.allclose(out, ref, atol=1e-5, rtol=1e-5)

    # 2) Larger batch to exercise the tiled/pipelined grid path (multiple tiles
    #    + a non-multiple-of-TM tail handled via padding).
    big_batch = 2048 + 40
    xb = jax.random.normal(kx2, (big_batch, IN_FEATURES), dtype=jnp.float32)
    outb = dummy_model_forward(xb, weight, bias)   # default threshold -> Pallas
    outb = jax.block_until_ready(outb)
    refb = xb @ weight.T + bias
    assert outb.shape == (big_batch, OUT_FEATURES)
    assert jnp.allclose(outb, refb, atol=1e-5, rtol=1e-5)

    print("KERNEL_OK")
</pallas_src>

<mosaic_0001>
module attributes {stable_mosaic.version = 11 : i64} {
  func.func @linear_kernel(%arg0: i32, %arg1: memref<8x10xf32, #tpu.memory_space<vmem>>, %arg2: memref<10x2xf32, #tpu.memory_space<vmem>>, %arg3: memref<1x2xf32, #tpu.memory_space<vmem>>, %arg4: memref<8x2xf32, #tpu.memory_space<vmem>>) attributes {dimension_semantics = [#tpu.dimension_semantics<parallel>], iteration_bounds = array<i64: 1>, scalar_prefetch = 0 : i64, scratch_operands = 0 : i64, tpu.core_type = #tpu.core_type<tc>, window_params = [{transform_indices = @transform_0, window_bounds = array<i64: 8, 10>}, {pipeline_mode = #tpu.pipeline_mode<synchronous>, transform_indices = @transform_1, window_bounds = array<i64: 10, 2>}, {pipeline_mode = #tpu.pipeline_mode<synchronous>, transform_indices = @transform_2, window_bounds = array<i64: 1, 2>}, {transform_indices = @transform_3, window_bounds = array<i64: 8, 2>}]} {
    %c0 = arith.constant 0 : index
    %c0_0 = arith.constant 0 : index
    %0 = vector.load %arg1[%c0, %c0_0] : memref<8x10xf32, #tpu.memory_space<vmem>>, vector<8x10xf32>
    %c0_1 = arith.constant 0 : index
    %c0_2 = arith.constant 0 : index
    %1 = vector.load %arg2[%c0_1, %c0_2] : memref<10x2xf32, #tpu.memory_space<vmem>>, vector<10x2xf32>
    %c0_3 = arith.constant 0 : index
    %c0_4 = arith.constant 0 : index
    %2 = vector.load %arg3[%c0_3, %c0_4] : memref<1x2xf32, #tpu.memory_space<vmem>>, vector<1x2xf32>
    %cst = arith.constant dense<0.000000e+00> : vector<8x2xf32>
    %3 = tpu.matmul %0, %1, %cst {dimension_numbers = #tpu.dot_dimension_numbers<[1], [0], [0], [1], [0, 0, 1, 1], [], []>} : vector<8x10xf32>, vector<10x2xf32>, vector<8x2xf32> -> vector<8x2xf32>
    %4 = vector.broadcast %2 : vector<1x2xf32> to vector<8x2xf32>
    %5 = arith.addf %3, %4 : vector<8x2xf32>
    %c0_5 = arith.constant 0 : index
    %c0_6 = arith.constant 0 : index
    %6 = vector.load %arg4[%c0_5, %c0_6] : memref<8x2xf32, #tpu.memory_space<vmem>>, vector<8x2xf32>
    tpu.vector_store %arg4[%c0_5, %c0_6], %5 {strides = array<i32>} : memref<8x2xf32, #tpu.memory_space<vmem>>, vector<8x2xf32>,
    return
  }
  func.func @transform_0(%arg0: i32) -> (i32, i32) {
    %c0_i32 = arith.constant 0 : i32
    %c0_i32_0 = arith.constant 0 : i32
    return %arg0, %c0_i32 : i32, i32
  }
  func.func @transform_1(%arg0: i32) -> (i32, i32) {
    %c0_i32 = arith.constant 0 : i32
    %c0_i32_0 = arith.constant 0 : i32
    %c0_i32_1 = arith.constant 0 : i32
    return %c0_i32, %c0_i32_0 : i32, i32
  }
  func.func @transform_2(%arg0: i32) -> (i32, i32) {
    %c0_i32 = arith.constant 0 : i32
    %c0_i32_0 = arith.constant 0 : i32
    %c0_i32_1 = arith.constant 0 : i32
    return %c0_i32, %c0_i32_0 : i32, i32
  }
  func.func @transform_3(%arg0: i32) -> (i32, i32) {
    %c0_i32 = arith.constant 0 : i32
    %c0_i32_0 = arith.constant 0 : i32
    return %arg0, %c0_i32 : i32, i32
  }
}

</mosaic_0001>

<bundles_post_ra>
// kernel: tpu_custom_call.1
= control target key start
LH: loop header
LB: loop body
LE: loop exit
PB: predicated region body
PF: predicated region fallthrough
CT: control target
= control target key end

     0   :  { %vm28_vm0 = vcmask 1041408   ;;  %v129_v0 = vmov 0.0|0.0   ;;  %vm130_vm1 = vmmov 1   ;;  %vm131_vm3 = vmmov 0   ;;  %s168_s1 = inlined_call_operand.vmem [shape: f32[10,2], index: 1, kind: input, shape index: {}]   ;;  %s169_s0 = inlined_call_operand.vmem [shape: f32[8,10], index: 0, kind: input, shape index: {}]   ;;  %s170_s2 = inlined_call_operand.vmem [shape: f32[1,2], index: 2, kind: input, shape index: {}]   ;;  %s171_s3 = inlined_call_operand.vmem [shape: f32[8,2], index: 3, kind: output, shape index: {}]  }
   0x1   :  { %121 = vmatprep.subr.bf16.mxu0 %v129_v0  ;;  %v15_v1 = vld [vmem:[%s168_s1] sm:$0xff]  ;;  %v16_v2 = vld [vmem:[%s168_s1 + $0x8] sm:$0x3]  ;;  %vm123_vm2 = vmpackc.low %vm28_vm0, %vm130_vm1  ;;  %v132_v4 = vmov 0.0   ;;  %vm24_vm4 = vcmask 80896   ;;  %vm102_vm5 = vcmask 15360  }
   0x2   :  { %v122_v3 = vpack.c.bf16 %v16_v2, %v15_v1  ;;  %118 = vmatprep.mubr.msk.f32.mxu0 %vm131_vm3, %v132_v4  ;;  %v14_v5 = vld [vmem:[%s169_s0] sm:$0xff] }
   0x3   :  { %v108_v6 = vld [vmem:[%s170_s2] ss:$0 sm:$0xff] }
   0x4   :  { %124 = vmatpush3.bf16.msk.msra.mxu0 %vm123_vm2, %v122_v3 }
   0x7   :  { %119 = vmatmul.mubr.msk.f32.vlgmr.msra.gmra.mrb[0].mxu0 %vm24_vm4, %v14_v5 }
  0xda   :  { %v98_v7 = vpop.f32.mrb[0].mxu0 }
  0xdb   :  { %v99_v8 = vadd.f32 %v108_v6, %v98_v7  ;;  %v120_v9 = vpop.f32.mrb[1].mxu0 }
  0xdd   :  { %103 = vst.msk [vmem:[%s171_s3] sm:$0xff] %vm102_vm5, %v99_v8 }

</bundles_post_ra>
